<compile_context>
chip_gen: v6e
topology: v6e:2x2x1
jax: 0.10.0
libtpu: 0.0.40
codegen_flags: <defaults>
</compile_context>

<pallas_src>
import functools

import jax
import jax.numpy as jnp
from jax.experimental import pallas as pl
from jax.experimental.pallas import tpu as pltpu

LANE = 128  # TPU lane width: last dim of every block should be a multiple of this


def _round_up(n, m):
    return ((n + m - 1) // m) * m


def _pad2d(a, rows, cols):
    pr, pc = rows - a.shape[0], cols - a.shape[1]
    if pr or pc:
        a = jnp.pad(a, ((0, pr), (0, pc)))
    return a


def _mlp_kernel(num_hidden_layers, x_ref, *refs):
    """One batch tile of the full forward pass.

    refs = (w0, b0, w1, b1, ..., w_out, b_out, out_ref)
    Weights are bf16 (K_pad, N_pad) and fully VMEM-resident across the grid;
    the x tile is bf16 (TM, in_pad); biases are f32 (1, N_pad).
    """
    out_ref = refs[-1]
    param_refs = refs[:-1]

    h = x_ref[...]                                      # bf16 (TM, K0_pad)
    # hidden layers: Linear + ReLU (unrolled; layer count is small and static)
    for l in range(num_hidden_layers):
        w = param_refs[2 * l][...]                      # bf16 (K_pad, N_pad)
        b = param_refs[2 * l + 1][...]                  # f32  (1, N_pad)
        acc = jnp.dot(h, w, preferred_element_type=jnp.float32) + b
        h = jnp.maximum(acc, 0.0).astype(jnp.bfloat16)  # back to bf16 for next MXU op
    # final Linear (no activation)
    w = param_refs[2 * num_hidden_layers][...]
    b = param_refs[2 * num_hidden_layers + 1][...]
    out = jnp.dot(h, w, preferred_element_type=jnp.float32) + b
    out_ref[...] = out.astype(out_ref.dtype)


def prepare_params(params, input_size, *, lane=LANE):
    """One-time parameter prep: pad feature dims to lane multiples, cast W to bf16.

    Call this ONCE per parameter set (outside the per-step forward / jit region) so
    the pads/casts do not re-run as HBM ops on every forward call.

    Returns (flat_params, meta) where flat_params = (w0, b0, w1, b1, ..., w_L, b_L).
    """
    in_pad = _round_up(input_size, lane)
    flat, k_pad = [], in_pad
    for w, b in params:
        w = jnp.asarray(w, jnp.float32)
        b = jnp.asarray(b, jnp.float32)
        n_pad = _round_up(w.shape[1], lane)
        flat.append(_pad2d(w, k_pad, n_pad).astype(jnp.bfloat16))
        flat.append(_pad2d(b.reshape(1, -1), 1, n_pad).astype(jnp.float32))
        k_pad = n_pad
    meta = {
        "num_hidden_layers": len(params) - 1,
        "in_pad": in_pad,
        "out_pad": k_pad,
        "out_features": int(params[-1][0].shape[1]),
    }
    return tuple(flat), meta


def simple_nn_forward(x, flat_params, meta, *, block_m=1024, out_dtype=jnp.float32):
    """SimpleNN forward pass with a single batch-tiled Pallas call.

    Args:
      x: (batch, input_size) float32.
      flat_params, meta: output of prepare_params() (padded bf16 weights, f32 biases).
      block_m: maximum batch tile; typical batches collapse to a single grid step.
      out_dtype: output element type (f32 matches PyTorch; bf16 halves writeback).
    Returns:
      (batch, output_size) out_dtype array.
    """
    num_hidden_layers = meta["num_hidden_layers"]
    in_pad = meta["in_pad"]
    out_pad = meta["out_pad"]
    out_features = meta["out_features"]

    batch = x.shape[0]

    # bf16 packs two rows per sublane -> minimum efficient tile is 16 rows.
    # Pick the largest tile (<= block_m) so common batch sizes run as grid=(1,).
    tm = min(_round_up(batch, 16), _round_up(block_m, 16))
    padded_batch = _round_up(batch, tm)

    # Per-call input prep (input-dependent, cannot be hoisted): pad + bf16 cast.
    x_p = _pad2d(x, padded_batch, in_pad).astype(jnp.bfloat16)

    # x / out tiles walk the batch grid; weights & biases use a constant block index
    # so they are loaded once and stay VMEM-resident. Buffered(1): no point
    # double-buffering a block that never changes (matters once weights get big).
    in_specs = [pl.BlockSpec((tm, in_pad), lambda i: (i, 0))]
    for p in flat_params:
        in_specs.append(
            pl.BlockSpec(p.shape, lambda i: (0, 0), pipeline_mode=pl.Buffered(1))
        )

    # VMEM budget from the actual footprint: double-buffered x/out tiles +
    # single-buffered resident params, plus headroom (floor 8 MiB, cap 64 MiB = v7x).
    out_itemsize = jnp.dtype(out_dtype).itemsize
    param_bytes = sum(int(p.size) * p.dtype.itemsize for p in flat_params)
    tile_bytes = 2 * (tm * in_pad * 2) + 2 * (tm * out_pad * out_itemsize)
    vmem_limit = int(min(max(param_bytes + tile_bytes + (2 << 20), 8 << 20), 64 << 20))

    # Advisory cost for XLA scheduling around this call.
    flops = 2 * padded_batch * sum(
        int(flat_params[2 * l].shape[0]) * int(flat_params[2 * l].shape[1])
        for l in range(num_hidden_layers + 1)
    )
    bytes_accessed = (
        int(x_p.size) * 2 + param_bytes + padded_batch * out_pad * out_itemsize
    )

    kernel = functools.partial(_mlp_kernel, num_hidden_layers)

    out_p = pl.pallas_call(
        kernel,
        out_shape=jax.ShapeDtypeStruct((padded_batch, out_pad), out_dtype),
        grid_spec=pl.GridSpec(
            grid=(padded_batch // tm,),
            in_specs=in_specs,
            out_specs=pl.BlockSpec((tm, out_pad), lambda i: (i, 0)),
        ),
        compiler_params=pltpu.CompilerParams(
            dimension_semantics=("parallel",),  # harmless at grid=(1,); shards tiles on v7x if >1
            vmem_limit_bytes=vmem_limit,
        ),
        cost_estimate=pl.CostEstimate(
            flops=int(flops), transcendentals=0, bytes_accessed=int(bytes_accessed)
        ),
    )(x_p, *flat_params)

    # Slice off the lane / batch padding (kept for API fidelity with the PyTorch
    # module; a downstream consumer could read the padded buffer directly instead).
    return out_p[:batch, :out_features]


def init_params(key, input_size, hidden_size, output_size, hidden_layers=1):
    """Deterministic parameter init mirroring nn.Linear shapes.

    PyTorch stores Linear weight as (out, in); we store the transpose (in, out).
    """
    layers = []
    dims_in = input_size
    keys = jax.random.split(key, max(1, hidden_layers) + 1)
    for i in range(max(1, hidden_layers)):
        kw, kb = jax.random.split(keys[i])
        bound = 1.0 / jnp.sqrt(dims_in)
        w = jax.random.uniform(kw, (dims_in, hidden_size), jnp.float32, -bound, bound)
        b = jax.random.uniform(kb, (hidden_size,), jnp.float32, -bound, bound)
        layers.append((w, b))
        dims_in = hidden_size
    kw, kb = jax.random.split(keys[-1])
    bound = 1.0 / jnp.sqrt(dims_in)
    w = jax.random.uniform(kw, (dims_in, output_size), jnp.float32, -bound, bound)
    b = jax.random.uniform(kb, (output_size,), jnp.float32, -bound, bound)
    layers.append((w, b))
    return layers


def reference_forward_f32(x, params):
    h = x
    for w, b in params[:-1]:
        h = jnp.maximum(h @ w + b, 0.0)
    w, b = params[-1]
    return h @ w + b


def reference_forward_bf16(x, params):
    """Matches the kernel's numerics: bf16 MXU inputs, f32 accumulate."""
    h = x.astype(jnp.bfloat16)
    for w, b in params[:-1]:
        acc = jnp.dot(h, w.astype(jnp.bfloat16), preferred_element_type=jnp.float32) + b
        h = jnp.maximum(acc, 0.0).astype(jnp.bfloat16)
    w, b = params[-1]
    return jnp.dot(h, w.astype(jnp.bfloat16), preferred_element_type=jnp.float32) + b


if __name__ == "__main__":
    key = jax.random.PRNGKey(0)
    k_x, k_p = jax.random.split(key)

    # Small model dims consistent with the PyTorch module spec.
    batch, input_size, hidden_size, output_size, hidden_layers = 64, 16, 32, 8, 2

    x = jax.random.normal(k_x, (batch, input_size), jnp.float32)
    params = init_params(k_p, input_size, hidden_size, output_size, hidden_layers)

    # One-time parameter prep (pad + bf16 cast) -- hoisted out of the forward call.
    flat_params, meta = prepare_params(params, input_size)

    out = simple_nn_forward(x, flat_params, meta)   # batch=64 -> single grid step
    out = jax.block_until_ready(out)
    assert out.shape == (batch, output_size)

    # Tight check against a bf16-matmul reference (same numerics as the kernel).
    ref_bf16 = reference_forward_bf16(x, params)
    assert jnp.allclose(out, ref_bf16, atol=1e-3, rtol=1e-3), "mismatch vs bf16 reference"

    # Loose sanity check against the full-f32 reference (bf16 rounding only).
    ref_f32 = reference_forward_f32(x, params)
    assert jnp.allclose(out, ref_f32, atol=5e-2, rtol=5e-2), "mismatch vs f32 reference"

    print("KERNEL_OK")
</pallas_src>

<mosaic_0001>
module attributes {stable_mosaic.version = 11 : i64} {
  func.func @_mlp_kernel(%arg0: i32, %arg1: memref<64x128xbf16, #tpu.memory_space<vmem>>, %arg2: memref<128x128xbf16, #tpu.memory_space<vmem>>, %arg3: memref<1x128xf32, #tpu.memory_space<vmem>>, %arg4: memref<128x128xbf16, #tpu.memory_space<vmem>>, %arg5: memref<1x128xf32, #tpu.memory_space<vmem>>, %arg6: memref<128x128xbf16, #tpu.memory_space<vmem>>, %arg7: memref<1x128xf32, #tpu.memory_space<vmem>>, %arg8: memref<64x128xf32, #tpu.memory_space<vmem>>) attributes {dimension_semantics = [#tpu.dimension_semantics<parallel>], iteration_bounds = array<i64: 1>, scalar_prefetch = 0 : i64, scratch_operands = 0 : i64, tpu.core_type = #tpu.core_type<tc>, window_params = [{transform_indices = @transform_0, window_bounds = array<i64: 64, 128>}, {pipeline_mode = #tpu.pipeline_mode<synchronous>, transform_indices = @transform_1, window_bounds = array<i64: 128, 128>}, {pipeline_mode = #tpu.pipeline_mode<synchronous>, transform_indices = @transform_2, window_bounds = array<i64: 1, 128>}, {pipeline_mode = #tpu.pipeline_mode<synchronous>, transform_indices = @transform_3, window_bounds = array<i64: 128, 128>}, {pipeline_mode = #tpu.pipeline_mode<synchronous>, transform_indices = @transform_4, window_bounds = array<i64: 1, 128>}, {pipeline_mode = #tpu.pipeline_mode<synchronous>, transform_indices = @transform_5, window_bounds = array<i64: 128, 128>}, {pipeline_mode = #tpu.pipeline_mode<synchronous>, transform_indices = @transform_6, window_bounds = array<i64: 1, 128>}, {transform_indices = @transform_7, window_bounds = array<i64: 64, 128>}]} {
    %c0 = arith.constant 0 : index
    %c0_0 = arith.constant 0 : index
    %0 = vector.load %arg1[%c0, %c0_0] : memref<64x128xbf16, #tpu.memory_space<vmem>>, vector<64x128xbf16>
    %c0_1 = arith.constant 0 : index
    %c0_2 = arith.constant 0 : index
    %1 = vector.load %arg2[%c0_1, %c0_2] : memref<128x128xbf16, #tpu.memory_space<vmem>>, vector<128x128xbf16>
    %c0_3 = arith.constant 0 : index
    %c0_4 = arith.constant 0 : index
    %2 = vector.load %arg3[%c0_3, %c0_4] : memref<1x128xf32, #tpu.memory_space<vmem>>, vector<1x128xf32>
    %cst = arith.constant dense<0.000000e+00> : vector<64x128xf32>
    %3 = tpu.matmul %0, %1, %cst {dimension_numbers = #tpu.dot_dimension_numbers<[1], [0], [0], [1], [0, 0, 1, 1], [], []>} : vector<64x128xbf16>, vector<128x128xbf16>, vector<64x128xf32> -> vector<64x128xf32>
    %4 = vector.broadcast %2 : vector<1x128xf32> to vector<64x128xf32>
    %5 = arith.addf %3, %4 : vector<64x128xf32>
    %cst_5 = arith.constant 0.000000e+00 : f32
    %6 = vector.broadcast %cst_5 : f32 to vector<64x128xf32>
    %7 = arith.maximumf %5, %6 : vector<64x128xf32>
    %8 = arith.truncf %7 : vector<64x128xf32> to vector<64x128xbf16>
    %c0_6 = arith.constant 0 : index
    %c0_7 = arith.constant 0 : index
    %9 = vector.load %arg4[%c0_6, %c0_7] : memref<128x128xbf16, #tpu.memory_space<vmem>>, vector<128x128xbf16>
    %c0_8 = arith.constant 0 : index
    %c0_9 = arith.constant 0 : index
    %10 = vector.load %arg5[%c0_8, %c0_9] : memref<1x128xf32, #tpu.memory_space<vmem>>, vector<1x128xf32>
    %cst_10 = arith.constant dense<0.000000e+00> : vector<64x128xf32>
    %11 = tpu.matmul %8, %9, %cst_10 {dimension_numbers = #tpu.dot_dimension_numbers<[1], [0], [0], [1], [0, 0, 1, 1], [], []>} : vector<64x128xbf16>, vector<128x128xbf16>, vector<64x128xf32> -> vector<64x128xf32>
    %12 = vector.broadcast %10 : vector<1x128xf32> to vector<64x128xf32>
    %13 = arith.addf %11, %12 : vector<64x128xf32>
    %cst_11 = arith.constant 0.000000e+00 : f32
    %14 = vector.broadcast %cst_11 : f32 to vector<64x128xf32>
    %15 = arith.maximumf %13, %14 : vector<64x128xf32>
    %16 = arith.truncf %15 : vector<64x128xf32> to vector<64x128xbf16>
    %c0_12 = arith.constant 0 : index
    %c0_13 = arith.constant 0 : index
    %17 = vector.load %arg6[%c0_12, %c0_13] : memref<128x128xbf16, #tpu.memory_space<vmem>>, vector<128x128xbf16>
    %c0_14 = arith.constant 0 : index
    %c0_15 = arith.constant 0 : index
    %18 = vector.load %arg7[%c0_14, %c0_15] : memref<1x128xf32, #tpu.memory_space<vmem>>, vector<1x128xf32>
    %cst_16 = arith.constant dense<0.000000e+00> : vector<64x128xf32>
    %19 = tpu.matmul %16, %17, %cst_16 {dimension_numbers = #tpu.dot_dimension_numbers<[1], [0], [0], [1], [0, 0, 1, 1], [], []>} : vector<64x128xbf16>, vector<128x128xbf16>, vector<64x128xf32> -> vector<64x128xf32>
    %20 = vector.broadcast %18 : vector<1x128xf32> to vector<64x128xf32>
    %21 = arith.addf %19, %20 : vector<64x128xf32>
    %c0_17 = arith.constant 0 : index
    %c0_18 = arith.constant 0 : index
    %22 = vector.load %arg8[%c0_17, %c0_18] : memref<64x128xf32, #tpu.memory_space<vmem>>, vector<64x128xf32>
    tpu.vector_store %arg8[%c0_17, %c0_18], %21 {strides = array<i32>} : memref<64x128xf32, #tpu.memory_space<vmem>>, vector<64x128xf32>,
    return
  }
  func.func @transform_0(%arg0: i32) -> (i32, i32) {
    %c0_i32 = arith.constant 0 : i32
    %c0_i32_0 = arith.constant 0 : i32
    return %arg0, %c0_i32 : i32, i32
  }
  func.func @transform_1(%arg0: i32) -> (i32, i32) {
    %c0_i32 = arith.constant 0 : i32
    %c0_i32_0 = arith.constant 0 : i32
    %c0_i32_1 = arith.constant 0 : i32
    return %c0_i32, %c0_i32_0 : i32, i32
  }
  func.func @transform_2(%arg0: i32) -> (i32, i32) {
    %c0_i32 = arith.constant 0 : i32
    %c0_i32_0 = arith.constant 0 : i32
    %c0_i32_1 = arith.constant 0 : i32
    return %c0_i32, %c0_i32_0 : i32, i32
  }
  func.func @transform_3(%arg0: i32) -> (i32, i32) {
    %c0_i32 = arith.constant 0 : i32
    %c0_i32_0 = arith.constant 0 : i32
    %c0_i32_1 = arith.constant 0 : i32
    return %c0_i32, %c0_i32_0 : i32, i32
  }
  func.func @transform_4(%arg0: i32) -> (i32, i32) {
    %c0_i32 = arith.constant 0 : i32
    %c0_i32_0 = arith.constant 0 : i32
    %c0_i32_1 = arith.constant 0 : i32
    return %c0_i32, %c0_i32_0 : i32, i32
  }
  func.func @transform_5(%arg0: i32) -> (i32, i32) {
    %c0_i32 = arith.constant 0 : i32
    %c0_i32_0 = arith.constant 0 : i32
    %c0_i32_1 = arith.constant 0 : i32
    return %c0_i32, %c0_i32_0 : i32, i32
  }
  func.func @transform_6(%arg0: i32) -> (i32, i32) {
    %c0_i32 = arith.constant 0 : i32
    %c0_i32_0 = arith.constant 0 : i32
    %c0_i32_1 = arith.constant 0 : i32
    return %c0_i32, %c0_i32_0 : i32, i32
  }
  func.func @transform_7(%arg0: i32) -> (i32, i32) {
    %c0_i32 = arith.constant 0 : i32
    %c0_i32_0 = arith.constant 0 : i32
    return %arg0, %c0_i32 : i32, i32
  }
}

</mosaic_0001>

<bundles_post_ra>
// kernel: tpu_custom_call.1
= control target key start
LH: loop header
LB: loop body
LE: loop exit
PB: predicated region body
PF: predicated region fallthrough
CT: control target
= control target key end

     0   :  { %12 = vsyncpa [#allocation3], 0  ;;  %s959_s0 = inlined_call_operand.hbm [shape: bf16[64,128], index: 0, kind: input, shape index: {}]   ;;  %s960_s1 = inlined_call_operand.hbm [shape: bf16[128,128], index: 1, kind: input, shape index: {}]   ;;  %s961_s2 = inlined_call_operand.vmem [shape: f32[1,128], index: 2, kind: input, shape index: {}]   ;;  %s962_s3 = inlined_call_operand.hbm [shape: bf16[128,128], index: 3, kind: input, shape index: {}]   ;;  %s963_s4 = inlined_call_operand.vmem [shape: f32[1,128], index: 4, kind: input, shape index: {}]   ;;  %s964_s5 = inlined_call_operand.hbm [shape: bf16[128,128], index: 5, kind: input, shape index: {}]   ;;  %s965_s6 = inlined_call_operand.vmem [shape: f32[1,128], index: 6, kind: input, shape index: {}]   ;;  %s966_s7 = inlined_call_operand.hbm [shape: f32[64,128], index: 7, kind: output, shape index: {}]  }
   0x1   :  { %13 = vsyncpa [#allocation6], 0 }
   0x2   :  { %14 = vsyncpa [#allocation9], 0 }
   0x3   :  { %15 = vsyncpa [#allocation4], 0  ;;  %s874_s24 = smov [#allocation5]   ;;  %s875_s26 = smov [#allocation2]  }
   0x4   :  { %s33_s25 = sshll.u32 %s874_s24, 4  ;;  %s21_s27 = sshll.u32 %s875_s26, 4  ;;  %s34_s25 = int_to_ptr.vmem [resolvable:$true] %s33_s25  ;;  %s22_s27 = int_to_ptr.vmem [resolvable:$true] %s21_s27 }
   0x5   :  { %s774_s28 = scalar_lea.vmem %s34_s25, 1024  ;;  %p779_p1 = scmp.lt.s32.totalorder %s34_s25, %s34_s25 }
   0x6   :  { %p775_p0 = scmp.ne.s32.totalorder %s34_s25, %s774_s28  ;;  %p780_p2 = scmp.lt.s32.totalorder %s774_s28, %s774_s28 }
   0x8   :  { %p781_p3 = por %p780_p2, %p779_p1 }
   0xa   :  { %p782_p4 = pnand %p781_p3, %p775_p0 }
   0xc   :  { %785 = shalt.err (!%p782_p4)
}
   0xd   :  { %s876_s29 = smov 64   ;;  %s877_s30 = smov 4  }
   0xe   :  { %39 = dma.hbm_to_vmem [thread:$0]  %s960_s1, 1024, %s34_s25, [#allocation6], %s876_s29, %s876_s29, %s877_s30  }
   0xf   :  { %s794_s10 = scalar_lea.vmem %s22_s27, 512  ;;  %p799_p6 = scmp.lt.s32.totalorder %s22_s27, %s22_s27 }
  0x10   :  { %p795_p5 = scmp.ne.s32.totalorder %s22_s27, %s794_s10  ;;  %p800_p7 = scmp.lt.s32.totalorder %s794_s10, %s794_s10 }
  0x12   :  { %p801_p8 = por %p800_p7, %p799_p6 }
  0x14   :  { %p802_p9 = pnand %p801_p8, %p795_p5 }
  0x16   :  { %805 = shalt.err (!%p802_p9)
}
  0x17   :  { %27 = dma.hbm_to_vmem [thread:$0]  %s959_s0, 512, %s22_s27, [#allocation3], %s876_s29, %s876_s29, %s877_s30  }
  0x18   :  { %s878_s13 = smov [#allocation7]   ;;  %s879_s15 = smov [#allocation8]  }
  0x19   :  { %s47_s14 = sshll.u32 %s878_s13, 4  ;;  %s61_s16 = sshll.u32 %s879_s15, 4  ;;  %s48_s14 = int_to_ptr.vmem [resolvable:$true] %s47_s14  ;;  %s62_s16 = int_to_ptr.vmem [resolvable:$true] %s61_s16 }
  0x1a   :  { %s814_s1 = scalar_lea.vmem %s48_s14, 1024  ;;  %p819_p11 = scmp.lt.s32.totalorder %s48_s14, %s48_s14 }
  0x1b   :  { %p815_p10 = scmp.ne.s32.totalorder %s48_s14, %s814_s1  ;;  %p820_p12 = scmp.lt.s32.totalorder %s814_s1, %s814_s1 }
  0x1d   :  { %p821_p13 = por %p820_p12, %p819_p11 }
  0x1f   :  { %p822_p0 = pnand %p821_p13, %p815_p10 }
  0x21   :  { %825 = shalt.err (!%p822_p0)
}
  0x22   :  { %53 = dma.hbm_to_vmem [thread:$0]  %s962_s3, 1024, %s48_s14, [#allocation6], %s876_s29, %s876_s29, %s877_s30  }
  0x23   :  { %s834_s0 = scalar_lea.vmem %s62_s16, 1024  ;;  %p839_p2 = scmp.lt.s32.totalorder %s62_s16, %s62_s16 }
  0x24   :  { %p835_p1 = scmp.ne.s32.totalorder %s62_s16, %s834_s0  ;;  %p840_p3 = scmp.lt.s32.totalorder %s834_s0, %s834_s0 }
  0x26   :  { %p841_p4 = por %p840_p3, %p839_p2 }
  0x28   :  { %p842_p5 = pnand %p841_p4, %p835_p1 }
  0x2a   :  { %845 = shalt.err (!%p842_p5)
}
  0x2b   :  { %67 = dma.hbm_to_vmem [thread:$0]  %s964_s5, 1024, %s62_s16, [#allocation9], %s876_s29, %s876_s29, %s877_s30  }
  0x2c   :  { %866 = dma.done.wait [#allocation3], 512  }
  0x2d   :  { %867 = vsyncadd [#allocation3], 4294966784 }
  0x2e   :  { %868 = dma.done.wait [#allocation6], 2048  }
  0x2f   :  { %869 = vsyncadd [#allocation6], 4294965248 }
  0x30   :  { %870 = dma.done.wait [#allocation9], 1024  }
  0x31   :  { %871 = vsyncadd [#allocation9], 4294966272  ;;  %v738_v0 = vld [vmem:[#allocation5 + $0x38] sm:$0xff]   ;;  %v739_v1 = vld [vmem:[#allocation5 + $0x30] sm:$0xff]   ;;  %s880_s23 = smov [#allocation10]  }
  0x32   :  { %641 = vmatprep.subr.bf16.mxu0 %v738_v0  ;;  %v740_v2 = vld [vmem:[#allocation5 + $0x28] sm:$0xff]   ;;  %v741_v3 = vld [vmem:[#allocation5 + $0x20] sm:$0xff]   ;;  %v742_v5 = vld [vmem:[#allocation5 + $0x18] sm:$0xff]   ;;  %s560_s24 = sshll.u32 %s880_s23, 4  ;;  %s561_s24 = int_to_ptr.vmem [resolvable:$true] %s560_s24 }
  0x33   :  { %642 = vmatpush3.bf16.msra.mxu0 %v738_v0  ;;  %v746_v4 = vld [vmem:[#allocation2] sm:$0xff]   ;;  %v750_v6 = vld [vmem:[#allocation7 + $0x38] sm:$0xff]   ;;  %v751_v7 = vld [vmem:[#allocation7 + $0x30] sm:$0xff]   ;;  %p851_p7 = scmp.lt.s32.totalorder %s561_s24, %s561_s24 }
  0x34   :  { %643 = vmatprep.subr.bf16.mxu0 %v739_v1  ;;  %657 = vmatprep.mubr.bf16.mxu0 %v746_v4  ;;  %v743_v8 = vld [vmem:[#allocation5 + $0x10] sm:$0xff]   ;;  %v752_v9 = vld [vmem:[#allocation7 + $0x28] sm:$0xff]   ;;  %v753_v11 = vld [vmem:[#allocation7 + $0x20] sm:$0xff]  }
  0x35   :  { %665 = vmatprep.subr.bf16.mxu1 %v750_v6  ;;  %v744_v10 = vld [vmem:[#allocation5 + $0x8] sm:$0xff]   ;;  %v745_v12 = vld [vmem:[#allocation5] sm:$0xff]   ;;  %v754_v13 = vld [vmem:[#allocation7 + $0x18] sm:$0xff]  }
  0x36   :  { %666 = vmatpush3.bf16.msra.mxu1 %v750_v6  ;;  %v747_v14 = vld [vmem:[#allocation2 + $0x8] sm:$0xff]   ;;  %v748_v15 = vld [vmem:[#allocation2 + $0x10] sm:$0xff]   ;;  %v749_v16 = vld [vmem:[#allocation2 + $0x18] sm:$0xff]  }
  0x37   :  { %644 = vmatpush3.bf16.msra.mxu0 %v739_v1  ;;  %667 = vmatprep.subr.bf16.mxu1 %v751_v7  ;;  %v755_v17 = vld [vmem:[#allocation7 + $0x10] sm:$0xff]   ;;  %v756_v18 = vld [vmem:[#allocation7 + $0x8] sm:$0xff]   ;;  %v757_v19 = vld [vmem:[#allocation7] sm:$0xff]  }
  0x38   :  { %645 = vmatprep.subr.bf16.mxu0 %v740_v2  ;;  %v758_v20 = vld [vmem:[#allocation8 + $0x38] sm:$0xff]   ;;  %v759_v21 = vld [vmem:[#allocation8 + $0x30] sm:$0xff]   ;;  %v760_v22 = vld [vmem:[#allocation8 + $0x28] sm:$0xff]  }
  0x39   :  { %v761_v23 = vld [vmem:[#allocation8 + $0x20] sm:$0xff]   ;;  %v762_v24 = vld [vmem:[#allocation8 + $0x18] sm:$0xff]   ;;  %v763_v54 = vld [vmem:[#allocation8 + $0x10] sm:$0xff]  }
  0x3a   :  { %668 = vmatpush3.bf16.msra.mxu1 %v751_v7  ;;  %v574_v27 = vld [vmem:[%s961_s2] ss:$0 sm:$0xff]  ;;  %v764_v55 = vld [vmem:[#allocation8 + $0x8] sm:$0xff]  }
  0x3b   :  { %646 = vmatpush3.bf16.msra.mxu0 %v740_v2  ;;  %669 = vmatprep.subr.bf16.mxu1 %v752_v9  ;;  %v765_v56 = vld [vmem:[#allocation8] sm:$0xff]  }
  0x3c   :  { %647 = vmatprep.subr.bf16.mxu0 %v741_v3  ;;  %v587_v59 = vld [vmem:[%s963_s4] ss:$0 sm:$0xff] }
  0x3e   :  { %670 = vmatpush3.bf16.msra.mxu1 %v752_v9 }
  0x3f   :  { %648 = vmatpush3.bf16.msra.mxu0 %v741_v3  ;;  %671 = vmatprep.subr.bf16.mxu1 %v753_v11 }
  0x40   :  { %649 = vmatprep.subr.bf16.mxu0 %v742_v5 }
  0x42   :  { %672 = vmatpush3.bf16.msra.mxu1 %v753_v11 }
  0x43   :  { %650 = vmatpush3.bf16.msra.mxu0 %v742_v5  ;;  %673 = vmatprep.subr.bf16.mxu1 %v754_v13 }
  0x44   :  { %651 = vmatprep.subr.bf16.mxu0 %v743_v8 }
  0x46   :  { %674 = vmatpush3.bf16.msra.mxu1 %v754_v13 }
  0x47   :  { %652 = vmatpush3.bf16.msra.mxu0 %v743_v8  ;;  %675 = vmatprep.subr.bf16.mxu1 %v755_v17 }
  0x48   :  { %653 = vmatprep.subr.bf16.mxu0 %v744_v10 }
  0x4a   :  { %676 = vmatpush3.bf16.msra.mxu1 %v755_v17 }
  0x4b   :  { %654 = vmatpush3.bf16.msra.mxu0 %v744_v10  ;;  %677 = vmatprep.subr.bf16.mxu1 %v756_v18 }
  0x4c   :  { %655 = vmatprep.subr.bf16.mxu0 %v745_v12 }
  0x4e   :  { %678 = vmatpush3.bf16.msra.mxu1 %v756_v18 }
  0x4f   :  { %656 = vmatpush3.bf16.msra.mxu0 %v745_v12  ;;  %679 = vmatprep.subr.bf16.mxu1 %v757_v19 }
  0x50   :  { %689 = vmatprep.subr.bf16.mxu0 %v758_v20 }
  0x52   :  { %658 = vmatmul.mubr.bf16.vlgmr.msra.gmra.mxu0 %v747_v14  ;;  %680 = vmatpush3.bf16.msra.mxu1 %v757_v19 }
  0x53   :  { %661 = vmatprep.mubr.bf16.mxu0 %v748_v15  ;;  %713 = vmatprep.subr.bf16.mxu1 %v758_v20 }
  0x54   :  { %690 = vmatpush3.bf16.msra.mxu0 %v758_v20 }
  0x55   :  { %691 = vmatprep.subr.bf16.mxu0 %v759_v21 }
  0x58   :  { %692 = vmatpush3.bf16.msra.mxu0 %v759_v21 }
  0x59   :  { %693 = vmatprep.subr.bf16.mxu0 %v760_v22 }
  0x5a   :  { %662 = vmatmul.mubr.bf16.gmra.mxu0 %v749_v16 }
  0x5c   :  { %694 = vmatpush3.bf16.msra.mxu0 %v760_v22 }
  0x5d   :  { %695 = vmatprep.subr.bf16.mxu0 %v761_v23 }
  0x60   :  { %696 = vmatpush3.bf16.msra.mxu0 %v761_v23 }
  0x61   :  { %697 = vmatprep.subr.bf16.mxu0 %v762_v24 }
  0x64   :  { %698 = vmatpush3.bf16.msra.mxu0 %v762_v24 }
  0x65   :  { %699 = vmatprep.subr.bf16.mxu0 %v763_v54 }
  0x68   :  { %700 = vmatpush3.bf16.msra.mxu0 %v763_v54 }
  0x69   :  { %701 = vmatprep.subr.bf16.mxu0 %v764_v55 }
  0x6c   :  { %702 = vmatpush3.bf16.msra.mxu0 %v764_v55 }
  0x6d   :  { %703 = vmatprep.subr.bf16.mxu0 %v765_v56 }
  0x70   :  { %704 = vmatpush3.bf16.msra.mxu0 %v765_v56 }
 0x112   :  { %v659_v25 = vpop.f32.mrf.mxu0 }
 0x113   :  { %v229_v31 = vadd.f32 %v659_v25, %v574_v27 }
 0x114   :  { %v220_v26 = vpop.f32.mrf.mxu0 }
 0x115   :  { %v221_v29 = vadd.f32 %v574_v27, %v220_v26  ;;  %v253_v38 = vmax.f32 %v229_v31, 0.0 }
 0x116   :  { %v660_v28 = vpop.f32.mrf.mxu0 }
 0x117   :  { %v232_v30 = vadd.f32 %v660_v28, %v574_v27  ;;  %v251_v36 = vmax.f32 %v221_v29, 0.0 }
 0x118   :  { %v223_v32 = vpop.f32.mrf.mxu0 }
 0x119   :  { %v224_v33 = vadd.f32 %v574_v27, %v223_v32  ;;  %v254_v34 = vmax.f32 %v232_v30, 0.0 }
 0x11a   :  { %v663_v35 = vpop.f32.mrf.mxu0 }
 0x11b   :  { %v252_v37 = vmax.f32 %v224_v33, 0.0  ;;  %v260_v41 = vpack.c.bf16 %v254_v34, %v253_v38  ;;  %v245_v45 = vadd.f32 %v663_v35, %v574_v27 }
 0x11c   :  { %v236_v39 = vpop.f32.mrf.mxu0 }
 0x11d   :  { %v259_v40 = vpack.c.bf16 %v252_v37, %v251_v36  ;;  %v237_v43 = vadd.f32 %v574_v27, %v236_v39  ;;  %v257_v51 = vmax.f32 %v245_v45, 0.0 }
 0x11e   :  { %v664_v42 = vpop.f32.mrf.mxu0 }
 0x11f   :  { %v248_v44 = vadd.f32 %v664_v42, %v574_v27  ;;  %681 = vmatprep.mubr.bf16.mxu1 %v259_v40  ;;  %v255_v49 = vmax.f32 %v237_v43, 0.0 }
 0x120   :  { %v239_v46 = vpop.f32.mrf.mxu0  ;;  %682 = vmatmul.mubr.bf16.vlgmr.msra.gmra.mxu1 %v260_v41 }
 0x121   :  { %v240_v47 = vadd.f32 %v574_v27, %v239_v46  ;;  %721 = vmatpush3.bf16.msra.mxu1 %v758_v20  ;;  %v258_v48 = vmax.f32 %v248_v44, 0.0 }
 0x122   :  { %714 = vmatprep.subr.bf16.mxu1 %v759_v21 }
 0x123   :  { %v256_v50 = vmax.f32 %v240_v47, 0.0  ;;  %v262_v53 = vpack.c.bf16 %v258_v48, %v257_v51 }
 0x125   :  { %v261_v52 = vpack.c.bf16 %v256_v50, %v255_v49  ;;  %722 = vmatpush3.bf16.msra.mxu1 %v759_v21 }
 0x126   :  { %715 = vmatprep.subr.bf16.mxu1 %v760_v22 }
 0x127   :  { %685 = vmatprep.mubr.bf16.mxu1 %v261_v52 }
 0x128   :  { %686 = vmatmul.mubr.bf16.gmra.mxu1 %v262_v53 }
 0x129   :  { %723 = vmatpush3.bf16.msra.mxu1 %v760_v22  ;;  %v596_v22 = vld [vmem:[%s965_s6] ss:$0 sm:$0xff]  ;;  %s846_s6 = scalar_lea.vmem %s561_s24, 1024 }
 0x12a   :  { %716 = vmatprep.subr.bf16.mxu1 %v761_v23  ;;  %p847_p6 = scmp.ne.s32.totalorder %s561_s24, %s846_s6  ;;  %p852_p8 = scmp.lt.s32.totalorder %s846_s6, %s846_s6 }
 0x12c   :  { %p853_p9 = por %p852_p8, %p851_p7 }
 0x12d   :  { %724 = vmatpush3.bf16.msra.mxu1 %v761_v23 }
 0x12e   :  { %717 = vmatprep.subr.bf16.mxu1 %v762_v24  ;;  %p854_p10 = pnand %p853_p9, %p847_p6 }
 0x131   :  { %725 = vmatpush3.bf16.msra.mxu1 %v762_v24 }
 0x132   :  { %718 = vmatprep.subr.bf16.mxu1 %v763_v54 }
 0x135   :  { %726 = vmatpush3.bf16.msra.mxu1 %v763_v54 }
 0x136   :  { %719 = vmatprep.subr.bf16.mxu1 %v764_v55 }
 0x139   :  { %727 = vmatpush3.bf16.msra.mxu1 %v764_v55 }
 0x13a   :  { %720 = vmatprep.subr.bf16.mxu1 %v765_v56 }
 0x13d   :  { %728 = vmatpush3.bf16.msra.mxu1 %v765_v56 }
 0x1e0   :  { %v683_v57 = vpop.f32.mrf.mxu1 }
 0x1e1   :  { %v377_v63 = vadd.f32 %v683_v57, %v587_v59 }
 0x1e2   :  { %v368_v58 = vpop.f32.mrf.mxu1 }
 0x1e3   :  { %v369_v61 = vadd.f32 %v587_v59, %v368_v58  ;;  %v401_v6 = vmax.f32 %v377_v63, 0.0 }
 0x1e4   :  { %v684_v60 = vpop.f32.mrf.mxu1 }
 0x1e5   :  { %v380_v62 = vadd.f32 %v684_v60, %v587_v59  ;;  %v399_v4 = vmax.f32 %v369_v61, 0.0 }
 0x1e6   :  { %v371_v0 = vpop.f32.mrf.mxu1 }
 0x1e7   :  { %v372_v1 = vadd.f32 %v587_v59, %v371_v0  ;;  %v402_v2 = vmax.f32 %v380_v62, 0.0 }
 0x1e8   :  { %v687_v3 = vpop.f32.mrf.mxu1 }
 0x1e9   :  { %v400_v5 = vmax.f32 %v372_v1, 0.0  ;;  %v408_v9 = vpack.c.bf16 %v402_v2, %v401_v6  ;;  %v393_v13 = vadd.f32 %v687_v3, %v587_v59 }
 0x1ea   :  { %v384_v7 = vpop.f32.mrf.mxu1 }
 0x1eb   :  { %v407_v8 = vpack.c.bf16 %v400_v5, %v399_v4  ;;  %v385_v11 = vadd.f32 %v587_v59, %v384_v7  ;;  %v405_v19 = vmax.f32 %v393_v13, 0.0 }
 0x1ec   :  { %v688_v10 = vpop.f32.mrf.mxu1 }
 0x1ed   :  { %v396_v12 = vadd.f32 %v688_v10, %v587_v59  ;;  %705 = vmatprep.mubr.bf16.mxu0 %v407_v8  ;;  %v403_v17 = vmax.f32 %v385_v11, 0.0 }
 0x1ee   :  { %v387_v14 = vpop.f32.mrf.mxu1  ;;  %706 = vmatmul.mubr.bf16.vlgmr.msra.gmra.mxu0 %v408_v9 }
 0x1ef   :  { %v388_v15 = vadd.f32 %v587_v59, %v387_v14  ;;  %v406_v16 = vmax.f32 %v396_v12, 0.0 }
 0x1f1   :  { %v404_v18 = vmax.f32 %v388_v15, 0.0  ;;  %v410_v21 = vpack.c.bf16 %v406_v16, %v405_v19 }
 0x1f3   :  { %v409_v20 = vpack.c.bf16 %v404_v18, %v403_v17 }
 0x1f5   :  { %709 = vmatprep.mubr.bf16.mxu1 %v409_v20 }
 0x1f6   :  { %710 = vmatmul.mubr.bf16.vlgmr.msra.gmra.mxu1 %v410_v21 }
 0x2ae   :  { %v707_v23 = vpop.f32.mrf.mxu0 }
 0x2af   :  { %v525_v24 = vadd.f32 %v707_v23, %v596_v22 }
 0x2b0   :  { %v516_v25 = vpop.f32.mrf.mxu0 }
 0x2b1   :  { %549 = vst [vmem:[#allocation10 + $0x10] sm:$0xff] %v525_v24  ;;  %v517_v26 = vadd.f32 %v596_v22, %v516_v25 }
 0x2b2   :  { %v708_v27 = vpop.f32.mrf.mxu0 }
 0x2b3   :  { %547 = vst [vmem:[#allocation10] sm:$0xff] %v517_v26  ;;  %v528_v28 = vadd.f32 %v708_v27, %v596_v22 }
 0x2b4   :  { %v519_v29 = vpop.f32.mrf.mxu0 }
 0x2b5   :  { %550 = vst [vmem:[#allocation10 + $0x18] sm:$0xff] %v528_v28  ;;  %v520_v30 = vadd.f32 %v596_v22, %v519_v29 }
 0x2b6   :  { %v711_v31 = vpop.f32.mrf.mxu1 }
 0x2b7   :  { %548 = vst [vmem:[#allocation10 + $0x8] sm:$0xff] %v520_v30  ;;  %v541_v32 = vadd.f32 %v711_v31, %v596_v22 }
 0x2b8   :  { %v532_v33 = vpop.f32.mrf.mxu1 }
 0x2b9   :  { %553 = vst [vmem:[#allocation10 + $0x30] sm:$0xff] %v541_v32  ;;  %v533_v34 = vadd.f32 %v596_v22, %v532_v33 }
 0x2ba   :  { %v712_v35 = vpop.f32.mrf.mxu1 }
 0x2bb   :  { %551 = vst [vmem:[#allocation10 + $0x20] sm:$0xff] %v533_v34  ;;  %v544_v36 = vadd.f32 %v712_v35, %v596_v22 }
 0x2bc   :  { %v535_v37 = vpop.f32.mrf.mxu1 }
 0x2bd   :  { %554 = vst [vmem:[#allocation10 + $0x38] sm:$0xff] %v544_v36  ;;  %v536_v38 = vadd.f32 %v596_v22, %v535_v37 }
 0x2bf   :  { %552 = vst [vmem:[#allocation10 + $0x28] sm:$0xff] %v536_v38 }
 0x2c0   :  { %857 = shalt.err (!%p854_p10)
}
 0x2c1   :  { %s881_s25 = smov 128   ;;  %s882_s26 = smov 8  }
 0x2c2   :  { %566 = dma.vmem_to_hbm [thread:$0]  %s561_s24, 1024, %s966_s7, [#allocation4], %s881_s25, %s881_s25, %s882_s26  }
 0x2c3   :  { %872 = dma.done.wait [#allocation4], 1024  }
 0x2c4   :  { %873 = vsyncadd [#allocation4], 4294966272 }
 0x2c5   :  { %570 = vsyncpa [#allocation3], 1 }
 0x2c6   :  { %571 = vsyncpa [#allocation6], 1 }
 0x2c7   :  { %572 = vsyncpa [#allocation9], 1 }
 0x2c8   :  { %573 = vsyncpa [#allocation4], 1 }

</bundles_post_ra>
